<compile_context>
chip_gen: v7x
topology: tpu7x:2x2x1
jax: 0.10.0
libtpu: 0.0.40
codegen_flags: <defaults>
</compile_context>

<pallas_src>
import math

import jax
import jax.numpy as jnp
from jax.experimental import pallas as pl
from jax.experimental.pallas import tpu as pltpu


def _swish_kernel(x_ref, scale_ref, o_ref):
    # x_ref:     (bm, tk) activation tile (rows = flattened batch*channel)
    # scale_ref: (bm, 1)  per-row scale (1 + beta[channel of row])
    x = x_ref[...].astype(jnp.float32)        # compute in f32 (v5e: no bf16 VPU/EUP)
    s = scale_ref[...].astype(jnp.float32)    # broadcasts along the lane axis
    e = jnp.exp(-(s * x))                     # transcendental -> EUP slot
    # x * sigmoid(s*x) == x / (1 + exp(-s*x)); stable (exp -> inf yields 0,
    # the correct limit).  HBM-bound, so the divide is free; if this ever gets
    # fused with real compute, swap for pl.reciprocal(1.0 + e, approx=True).
    o_ref[...] = (x / (1.0 + e)).astype(o_ref.dtype)


def _divisors(n):
    ds = set()
    d = 1
    while d * d <= n:
        if n % d == 0:
            ds.add(d)
            ds.add(n // d)
        d += 1
    return ds


def _pick_tiles(M, HW, itemsize, max_tile_bytes, *,
                min_blocks=8, min_split_tile_bytes=2 * 1024 * 1024):
    """Pick (bm, tk) for a (M, HW) slab.

    bm is a multiple of 8 dividing M (or M itself if M % 8 != 0); tk is a
    multiple of 128 dividing HW (or HW itself if HW % 128 != 0).  Tiles are
    bounded by max_tile_bytes; when the shape allows, the grid is split to at
    least `min_blocks` blocks without dropping below min_split_tile_bytes.
    """
    # --- rows (sublane axis): multiple of 8, or the full extent.
    bm_min = 8 if (M % 8 == 0) else M

    # --- lanes: largest multiple of 128 dividing HW that fits the budget at bm_min.
    if HW % 128 == 0:
        q = HW // 128
        budget_lanes = max(128, max_tile_bytes // (bm_min * itemsize))
        ks = [k for k in _divisors(q) if k * 128 <= budget_lanes]
        tk = (max(ks) if ks else 1) * 128
    else:
        tk = HW   # ragged spatial extent -> full-extent (masked-lane) fallback

    # --- grow rows under budget (multiples of 8 that divide M).
    bm = bm_min
    if M % 8 == 0:
        cands = [8 * d for d in _divisors(M // 8)
                 if 8 * d * tk * itemsize <= max_tile_bytes]
        if cands:
            bm = max(cands)

    # --- ensure enough blocks for pipeline overlap and both v7x TensorCores,
    #     but never shrink below the per-step-overhead floor.
    def n_blocks(bm_, tk_):
        return (M // bm_) * (HW // tk_)

    while n_blocks(bm, tk) < min_blocks:
        nbm, ntk = bm, tk
        # Prefer splitting rows: keeps the lane-dense store width.
        if M % 8 == 0 and bm > 8:
            row_c = [8 * d for d in _divisors(M // 8) if 8 * d < bm]
            if row_c:
                nbm = max(row_c)
        if nbm == bm and HW % 128 == 0 and tk > 128:
            lane_c = [128 * k for k in _divisors(HW // 128) if 128 * k < tk]
            if lane_c:
                ntk = max(lane_c)
        if (nbm, ntk) == (bm, tk):
            break
        if nbm * ntk * itemsize < min_split_tile_bytes:
            break
        bm, tk = nbm, ntk

    return bm, tk


def swish_pallas(x, beta, *,
                 max_tile_bytes=8 * 1024 * 1024,
                 vmem_limit_bytes=48 * 1024 * 1024):
    """x: (N, C, *spatial); beta: (C,). Returns x * sigmoid((1 + beta[c]) * x)."""
    assert x.ndim >= 2
    N, C = x.shape[0], x.shape[1]
    assert beta.shape == (C,)
    HW = int(math.prod(x.shape[2:])) if x.ndim > 2 else 1
    M = N * C

    # 2D slab: rows = (batch, channel), lanes = flattened spatial (lane-dense).
    x2 = x.reshape(M, HW)
    # Per-row scale 1 + beta[row % C]; tiny (M, 1) array, blocks ride the row axis.
    scale = jnp.tile(1.0 + beta.astype(jnp.float32), N).reshape(M, 1)

    bm, tk = _pick_tiles(M, HW, x.dtype.itemsize, max_tile_bytes)
    grid = (M // bm, HW // tk)

    out2 = pl.pallas_call(
        _swish_kernel,
        out_shape=jax.ShapeDtypeStruct((M, HW), x.dtype),
        grid_spec=pltpu.PrefetchScalarGridSpec(
            num_scalar_prefetch=0,
            grid=grid,
            in_specs=[
                pl.BlockSpec((bm, tk), lambda i, j: (i, j)),
                pl.BlockSpec((bm, 1), lambda i, j: (i, 0)),
            ],
            out_specs=pl.BlockSpec((bm, tk), lambda i, j: (i, j)),
        ),
        compiler_params=pltpu.CompilerParams(
            dimension_semantics=("parallel", "parallel"),
            # Double-buffered in + out tiles (~4x max_tile_bytes = 32 MiB) plus
            # the tiny scale fit comfortably: raises v5e's 16 MiB scoped default
            # and stays under v7x's 64 MiB physical VMEM.
            vmem_limit_bytes=vmem_limit_bytes,
        ),
    )(x2, scale)

    return out2.reshape(x.shape)


def _reference(x, beta):
    C = beta.shape[0]
    shape = (1, C) + (1,) * (x.ndim - 2)
    ex_beta = (1.0 + beta).reshape(shape)
    return x * jax.nn.sigmoid(ex_beta * x)


if __name__ == "__main__":
    k1, k2 = jax.random.split(jax.random.PRNGKey(0))

    # Primary shape implied by the module (NCHW conv activations).
    N, C, H, W = 2, 4, 16, 16
    x = jax.random.normal(k1, (N, C, H, W), dtype=jnp.float32)

    # PyTorch init: beta filled with init*4 - 1 (default init=0.25 -> beta = 0).
    init = 0.25 * 4.0
    beta = jnp.full((C,), init - 1.0, dtype=jnp.float32)

    out = jax.block_until_ready(swish_pallas(x, beta))
    ref = _reference(x, beta)
    assert out.shape == x.shape and out.dtype == x.dtype
    assert jnp.allclose(out, ref, atol=1e-5, rtol=1e-5)

    # Secondary shape: non-128-multiple spatial extent, C not a multiple of 8,
    # and non-trivial beta -> exercises the full-extent fallback path.
    x2 = jax.random.normal(k2, (2, 3, 5, 7), dtype=jnp.float32)
    beta2 = jnp.linspace(-0.5, 0.5, 3, dtype=jnp.float32)
    out2 = jax.block_until_ready(swish_pallas(x2, beta2))
    assert jnp.allclose(out2, _reference(x2, beta2), atol=1e-5, rtol=1e-5)

    print("KERNEL_OK")
</pallas_src>

<mosaic_0001>
module attributes {stable_mosaic.version = 11 : i64} {
  func.func @_swish_kernel(%arg0: i32, %arg1: i32, %arg2: memref<8x256xf32, #tpu.memory_space<vmem>>, %arg3: memref<8x1xf32, #tpu.memory_space<vmem>>, %arg4: memref<8x256xf32, #tpu.memory_space<vmem>>) attributes {dimension_semantics = [#tpu.dimension_semantics<parallel>, #tpu.dimension_semantics<parallel>], iteration_bounds = array<i64: 1, 1>, scalar_prefetch = 0 : i64, scratch_operands = 0 : i64, tpu.core_type = #tpu.core_type<tc>, window_params = [{transform_indices = @transform_0, window_bounds = array<i64: 8, 256>}, {transform_indices = @transform_1, window_bounds = array<i64: 8, 1>}, {transform_indices = @transform_2, window_bounds = array<i64: 8, 256>}]} {
    %c0 = arith.constant 0 : index
    %c0_0 = arith.constant 0 : index
    %0 = vector.load %arg2[%c0, %c0_0] : memref<8x256xf32, #tpu.memory_space<vmem>>, vector<8x256xf32>
    %c0_1 = arith.constant 0 : index
    %c0_2 = arith.constant 0 : index
    %1 = vector.load %arg3[%c0_1, %c0_2] : memref<8x1xf32, #tpu.memory_space<vmem>>, vector<8x1xf32>
    %2 = vector.broadcast %1 : vector<8x1xf32> to vector<8x256xf32>
    %3 = arith.mulf %2, %0 : vector<8x256xf32>
    %cst = arith.constant 0.000000e+00 : f32
    %4 = vector.broadcast %cst : f32 to vector<8x256xf32>
    %5 = arith.subf %4, %3 : vector<8x256xf32>
    %6 = math.exp %5 : vector<8x256xf32>
    %cst_3 = arith.constant 1.000000e+00 : f32
    %7 = vector.broadcast %cst_3 : f32 to vector<8x256xf32>
    %8 = arith.addf %7, %6 : vector<8x256xf32>
    %9 = arith.divf %0, %8 : vector<8x256xf32>
    %c0_4 = arith.constant 0 : index
    %c0_5 = arith.constant 0 : index
    %10 = vector.load %arg4[%c0_4, %c0_5] : memref<8x256xf32, #tpu.memory_space<vmem>>, vector<8x256xf32>
    tpu.vector_store %arg4[%c0_4, %c0_5], %9 {strides = array<i32>} : memref<8x256xf32, #tpu.memory_space<vmem>>, vector<8x256xf32>,
    return
  }
  func.func @transform_0(%arg0: i32, %arg1: i32) -> (i32, i32) {
    %c0_i32 = arith.constant 0 : i32
    return %arg0, %arg1 : i32, i32
  }
  func.func @transform_1(%arg0: i32, %arg1: i32) -> (i32, i32) {
    %c0_i32 = arith.constant 0 : i32
    %c0_i32_0 = arith.constant 0 : i32
    return %arg0, %c0_i32 : i32, i32
  }
  func.func @transform_2(%arg0: i32, %arg1: i32) -> (i32, i32) {
    %c0_i32 = arith.constant 0 : i32
    return %arg0, %arg1 : i32, i32
  }
}

</mosaic_0001>

<bundles_post_ra>
// kernel: tpu_custom_call.1
= control target key start
LH: loop header
LB: loop body
LE: loop exit
PB: predicated region body
PF: predicated region fallthrough
CT: control target
= control target key end

     0   :  { %7 = vsyncpa [#allocation3], 0  ;;  %s168_s0 = inlined_call_operand.hbm [shape: f32[8,256], index: 0, kind: input, shape index: {}]   ;;  %s169_s1 = inlined_call_operand.vmem [shape: f32[8,1], index: 1, kind: input, shape index: {}]   ;;  %s170_s2 = inlined_call_operand.hbm [shape: f32[8,256], index: 2, kind: output, shape index: {}]  }
   0x1   :  { %8 = vsyncpa [#allocation4], 0  ;;  %s123_s9 = smov [#allocation2]   ;;  %s75_s13 = scalar_lea.hbm %s168_s0, 256 }
   0x2   :  { %s15_s10 = sshll.u32 %s123_s9, 4  ;;  %p76_p0 = scmp.ne.s32.totalorder %s168_s0, %s75_s13  ;;  %s16_s10 = int_to_ptr.vmem [resolvable:$true] %s15_s10 }
   0x3   :  { %p79_p1 = scmp.lt.u32.totalorder %s75_s13, %s168_s0 }
   0x5   :  { %p81_p2 = pnand %p79_p1, %p76_p0 }
   0x7   :  { %84 = shalt.err (!%p81_p2)
}
   0x8   :  { %s85_s18 = scalar_lea.vmem %s16_s10, 256  ;;  %p90_p4 = scmp.lt.s32.totalorder %s16_s10, %s16_s10 }
   0x9   :  { %p86_p3 = scmp.ne.s32.totalorder %s16_s10, %s85_s18  ;;  %p91_p5 = scmp.lt.s32.totalorder %s85_s18, %s85_s18 }
   0xb   :  { %p92_p6 = por %p91_p5, %p90_p4 }
   0xd   :  { %p93_p7 = pnand %p92_p6, %p86_p3 }
   0xf   :  { %96 = shalt.err (!%p93_p7)
}
  0x10   :  { %18 = dma.hbm_to_vmem [thread:$0]  %s168_s0, 256, %s16_s10, [#allocation3]  }
  0x11   :  { %119 = dma.done.wait [#allocation3], 256  }
  0x12   :  { %120 = vsyncadd [#allocation3], 4294967040  ;;  %v124_v0 = vmov 0   ;;  %v26_v1 = vld [vmem:[%s169_s1] sm:$0xff]  ;;  %v25_v3 = vld [vmem:[#allocation2 + $0x8] sm:$0xff]  ;;  %s125_s0 = smov [#allocation5]  }
  0x13   :  { %66 = vset.pattern.permute.xlu0 %v124_v0  ;;  %v24_v2 = vld [vmem:[#allocation2] sm:$0xff]  ;;  %s54_s1 = sshll.u32 %s125_s0, 4  ;;  %s55_s1 = int_to_ptr.vmem [resolvable:$true] %s54_s1 }
  0x14   :  { %29 = vperm.xlu0 %66, %v26_v1   ;;  %s97_s23 = scalar_lea.vmem %s55_s1, 256  ;;  %p102_p9 = scmp.lt.s32.totalorder %s55_s1, %s55_s1 }
  0x15   :  { %p98_p8 = scmp.ne.s32.totalorder %s55_s1, %s97_s23  ;;  %p103_p10 = scmp.lt.s32.totalorder %s97_s23, %s97_s23 }
  0x17   :  { %p104_p11 = por %p103_p10, %p102_p9 }
  0x19   :  { %p105_p12 = pnand %p104_p11, %p98_p8 }
  0x93   :  { %v30_v4 = vpop.permute.xlu0 %29 }
  0x94   :  { %v32_v5 = vmul.f32 %v30_v4, %v24_v2  ;;  %v33_v6 = vmul.f32 %v30_v4, %v25_v3 }
  0x96   :  { %v34_v7 = vsub.f32 0.0, %v32_v5  ;;  %v35_v8 = vsub.f32 0.0, %v33_v6 }
  0x98   :  { %v36_v9 = vmul.f32 1.442695, %v34_v7  ;;  %v38_v10 = vmul.f32 1.442695, %v35_v8 }
  0x9a   :  { %67 = vpow2.f32 %v36_v9 }
  0x9b   :  { %69 = vpow2.f32 %v38_v10 }
  0xa4   :  { %v68_v11 = vpop.eup %67 }
  0xa5   :  { %v70_v12 = vpop.eup %69  ;;  %v40_v13 = vadd.f32 1.0, %v68_v11 }
  0xa6   :  { %v41_v14 = vadd.f32 1.0, %v70_v12 }
  0xa7   :  { %71 = vrcp.f32 %v40_v13 }
  0xa8   :  { %73 = vrcp.f32 %v41_v14 }
  0xb1   :  { %v72_v15 = vpop.eup %71 }
  0xb2   :  { %v74_v16 = vpop.eup %73  ;;  %v43_v17 = vmul.f32 %v72_v15, %v24_v2 }
  0xb3   :  { %v45_v18 = vmul.f32 %v74_v16, %v25_v3 }
  0xb4   :  { %46 = vst [vmem:[#allocation5] sm:$0xff] %v43_v17 }
  0xb5   :  { %47 = vst [vmem:[#allocation5 + $0x8] sm:$0xff] %v45_v18 }
  0xb6   :  { %108 = shalt.err (!%p105_p12)
}
  0xb7   :  { %s109_s26 = scalar_lea.hbm %s170_s2, 256 }
  0xb8   :  { %p110_p13 = scmp.ne.s32.totalorder %s170_s2, %s109_s26  ;;  %p113_p0 = scmp.lt.u32.totalorder %s109_s26, %s170_s2 }
  0xba   :  { %p115_p1 = pnand %p113_p0, %p110_p13 }
  0xbc   :  { %118 = shalt.err (!%p115_p1)
}
  0xbd   :  { %57 = dma.vmem_to_hbm [thread:$0]  %s55_s1, 256, %s170_s2, [#allocation4]  }
  0xbe   :  { %121 = dma.done.wait [#allocation4], 256  }
  0xbf   :  { %122 = vsyncadd [#allocation4], 4294967040 }
  0xc0   :  { %61 = vsyncpa [#allocation3], 1 }
  0xc1   :  { %62 = vsyncpa [#allocation4], 1 }

</bundles_post_ra>
